<compile_context>
chip_gen: v7x
topology: tpu7x:2x2x1
jax: 0.10.0
libtpu: 0.0.40
codegen_flags: <defaults>
</compile_context>

<pallas_src>
import math

import jax
import jax.numpy as jnp
from jax.experimental import pallas as pl
from jax.experimental.pallas import tpu as pltpu


def _round_up(x, m):
    return -(-x // m) * m


def _pick_row_tile(n_pad):
    # Prefer >= 2 row tiles so the "parallel" axis can shard across v7x's 2 TensorCores.
    for cand in (512, 256, 128):
        if n_pad % cand == 0 and n_pad // cand >= 2:
            return cand
    return 128


def _pick_k_tile(n_pad):
    for cand in (1024, 512, 256, 128):
        if n_pad % cand == 0:
            return cand
    return 128


def _feature_transform_kernel(x_ref, w_ref, h_ref):
    # H = x @ W  (f32 accumulate on MXU, bf16 output to halve downstream HBM traffic)
    h_ref[...] = jnp.dot(x_ref[...], w_ref[...],
                         preferred_element_type=jnp.float32).astype(h_ref.dtype)


def _aggregate_kernel(adj_ref, h_ref, b_ref, o_ref, acc_ref):
    # out = relu(adj @ H + b), K-tiled with an f32 VMEM accumulator.
    k = pl.program_id(1)

    @pl.when(k == 0)
    def _():
        acc_ref[...] = jnp.zeros_like(acc_ref)

    acc_ref[...] += jnp.dot(adj_ref[...], h_ref[...],
                            preferred_element_type=jnp.float32)

    @pl.when(k == pl.num_programs(1) - 1)
    def _():
        o_ref[...] = jnp.maximum(acc_ref[...] + b_ref[...], 0.0).astype(o_ref.dtype)


def _gcn_layer(adj_bf16, x, w_pad, b_pad, *, tm, tk):
    """relu(adj @ (x @ w_pad) + b_pad) on padded, lane-dense operands."""
    n_pad = adj_bf16.shape[0]
    f_in = x.shape[1]
    f_pad = w_pad.shape[1]

    # --- feature transform: H = x @ W  (bf16 output) ---
    h = pl.pallas_call(
        _feature_transform_kernel,
        out_shape=jax.ShapeDtypeStruct((n_pad, f_pad), jnp.bfloat16),
        grid_spec=pltpu.PrefetchScalarGridSpec(
            num_scalar_prefetch=0,
            grid=(n_pad // tm,),
            in_specs=[
                pl.BlockSpec((tm, f_in), lambda i: (i, 0)),       # x row tile
                pl.BlockSpec((f_in, f_pad), lambda i: (0, 0)),    # full (small) weight
            ],
            out_specs=pl.BlockSpec((tm, f_pad), lambda i: (i, 0)),
        ),
        compiler_params=pltpu.CompilerParams(
            dimension_semantics=("parallel",)),
    )(x, w_pad)

    # --- aggregation: relu(adj @ H + b), row-parallel x K-reduction grid ---
    flops = 2 * n_pad * n_pad * f_pad
    bytes_accessed = (adj_bf16.size * adj_bf16.dtype.itemsize
                      + h.size * h.dtype.itemsize * (n_pad // tm)
                      + n_pad * f_pad * 4)
    out = pl.pallas_call(
        _aggregate_kernel,
        out_shape=jax.ShapeDtypeStruct((n_pad, f_pad), jnp.float32),
        grid_spec=pltpu.PrefetchScalarGridSpec(
            num_scalar_prefetch=0,
            grid=(n_pad // tm, n_pad // tk),
            in_specs=[
                pl.BlockSpec((tm, tk), lambda i, k: (i, k)),      # adj row/K tile (bf16)
                pl.BlockSpec((tk, f_pad), lambda i, k: (k, 0)),   # H K-slab (bf16)
                pl.BlockSpec((1, f_pad), lambda i, k: (0, 0)),    # bias
            ],
            out_specs=pl.BlockSpec((tm, f_pad), lambda i, k: (i, 0)),
            scratch_shapes=[pltpu.VMEM((tm, f_pad), jnp.float32)],
        ),
        compiler_params=pltpu.CompilerParams(
            dimension_semantics=("parallel", "arbitrary")),
        cost_estimate=pl.CostEstimate(flops=int(flops), transcendentals=0,
                                      bytes_accessed=int(bytes_accessed)),
    )(adj_bf16, h, b_pad)
    return out


def gcn_encoder_forward(x, adj, w1, b1, w2, b2):
    """GCNEncoder.forward (n_layer=2, graph=False, eval mode)."""
    n, _ = x.shape
    nhid = w1.shape[1]

    n_pad = _round_up(n, 128)
    f_pad = _round_up(nhid, 128)
    tm = _pick_row_tile(n_pad)
    tk = _pick_k_tile(n_pad)

    # Zero-pad to tile boundaries and a lane-dense (multiple-of-128) feature dim.
    adj_p = jnp.pad(adj, ((0, n_pad - n), (0, n_pad - n)))
    x_p = jnp.pad(x, ((0, n_pad - n), (0, 0)))
    w1_p = jnp.pad(w1, ((0, 0), (0, f_pad - nhid)))
    b1_p = jnp.pad(b1, (0, f_pad - nhid)).reshape(1, f_pad)
    w2_p = jnp.pad(w2, ((0, f_pad - nhid), (0, f_pad - nhid)))
    b2_p = jnp.pad(b2, (0, f_pad - nhid)).reshape(1, f_pad)

    # adj dominates HBM traffic -> bf16 once, reused by both layers (f32 accumulation).
    adj_bf16 = adj_p.astype(jnp.bfloat16)

    h1 = _gcn_layer(adj_bf16, x_p, w1_p, b1_p, tm=tm, tk=tk)      # ReLU fused in kernel
    # TODO(synk): F.dropout is identity in eval mode; training-mode dropout would use pltpu.prng_*.
    h2 = _gcn_layer(adj_bf16, h1, w2_p, b2_p, tm=tm, tk=tk)       # ReLU fused in kernel
    # graph=False in the default encoder config, so no mean pooling.
    return h2[:n, :nhid]


def gcn_encoder_reference(x, adj, w1, b1, w2, b2):
    h = jnp.maximum(jnp.matmul(jnp.matmul(adj, x), w1) + b1, 0.0)
    h = jnp.maximum(jnp.matmul(jnp.matmul(adj, h), w2) + b2, 0.0)
    return h


if __name__ == "__main__":
    # Small deterministic problem: 200 nodes (exercises padding path), 16 -> 32 features.
    N, NFEAT, NHID = 200, 16, 32

    key = jax.random.PRNGKey(0)
    k_adj, k_x, k_w1, k_b1, k_w2, k_b2 = jax.random.split(key, 6)

    # Node features and a symmetrized, row-normalized dense adjacency.
    x = jax.random.normal(k_x, (N, NFEAT), dtype=jnp.float32)
    a = jax.random.uniform(k_adj, (N, N), dtype=jnp.float32)
    adj = (a + a.T) * 0.5 + jnp.eye(N, dtype=jnp.float32)
    adj = adj / jnp.sum(adj, axis=1, keepdims=True)

    # Parameter init matching GraphConvolution.reset_parameters (stdv = 1/sqrt(out_features)).
    stdv = 1.0 / math.sqrt(NHID)
    w1 = jax.random.uniform(k_w1, (NFEAT, NHID), dtype=jnp.float32,
                            minval=-stdv, maxval=stdv)
    b1 = jax.random.uniform(k_b1, (NHID,), dtype=jnp.float32,
                            minval=-stdv, maxval=stdv)
    w2 = jax.random.uniform(k_w2, (NHID, NHID), dtype=jnp.float32,
                            minval=-stdv, maxval=stdv)
    b2 = jax.random.uniform(k_b2, (NHID,), dtype=jnp.float32,
                            minval=-stdv, maxval=stdv)

    out = gcn_encoder_forward(x, adj, w1, b1, w2, b2)
    out = jax.block_until_ready(out)

    ref = gcn_encoder_reference(x, adj, w1, b1, w2, b2)
    assert out.shape == (N, NHID)
    # bf16 adj/H with f32 accumulation -> slightly looser tolerance vs pure-f32 reference.
    assert jnp.allclose(out, ref, atol=2e-2, rtol=2e-2), "mismatch vs reference"

    print("KERNEL_OK")
</pallas_src>

<mosaic_0001>
module attributes {stable_mosaic.version = 11 : i64} {
  func.func @_feature_transform_kernel(%arg0: i32, %arg1: memref<128x16xf32, #tpu.memory_space<vmem>>, %arg2: memref<16x128xf32, #tpu.memory_space<vmem>>, %arg3: memref<128x128xbf16, #tpu.memory_space<vmem>>) attributes {dimension_semantics = [#tpu.dimension_semantics<parallel>], iteration_bounds = array<i64: 2>, scalar_prefetch = 0 : i64, scratch_operands = 0 : i64, tpu.core_type = #tpu.core_type<tc>, window_params = [{transform_indices = @transform_0, window_bounds = array<i64: 128, 16>}, {pipeline_mode = #tpu.pipeline_mode<synchronous>, transform_indices = @transform_1, window_bounds = array<i64: 16, 128>}, {transform_indices = @transform_2, window_bounds = array<i64: 128, 128>}]} {
    %c0 = arith.constant 0 : index
    %c0_0 = arith.constant 0 : index
    %0 = vector.load %arg1[%c0, %c0_0] : memref<128x16xf32, #tpu.memory_space<vmem>>, vector<128x16xf32>
    %c0_1 = arith.constant 0 : index
    %c0_2 = arith.constant 0 : index
    %1 = vector.load %arg2[%c0_1, %c0_2] : memref<16x128xf32, #tpu.memory_space<vmem>>, vector<16x128xf32>
    %cst = arith.constant dense<0.000000e+00> : vector<128x128xf32>
    %2 = tpu.matmul %0, %1, %cst {dimension_numbers = #tpu.dot_dimension_numbers<[1], [0], [0], [1], [0, 0, 1, 1], [], []>} : vector<128x16xf32>, vector<16x128xf32>, vector<128x128xf32> -> vector<128x128xf32>
    %3 = arith.truncf %2 : vector<128x128xf32> to vector<128x128xbf16>
    %c0_3 = arith.constant 0 : index
    %c0_4 = arith.constant 0 : index
    %4 = vector.load %arg3[%c0_3, %c0_4] : memref<128x128xbf16, #tpu.memory_space<vmem>>, vector<128x128xbf16>
    tpu.vector_store %arg3[%c0_3, %c0_4], %3 {strides = array<i32>} : memref<128x128xbf16, #tpu.memory_space<vmem>>, vector<128x128xbf16>,
    return
  }
  func.func @transform_0(%arg0: i32) -> (i32, i32) {
    %c0_i32 = arith.constant 0 : i32
    %c0_i32_0 = arith.constant 0 : i32
    return %arg0, %c0_i32 : i32, i32
  }
  func.func @transform_1(%arg0: i32) -> (i32, i32) {
    %c0_i32 = arith.constant 0 : i32
    %c0_i32_0 = arith.constant 0 : i32
    %c0_i32_1 = arith.constant 0 : i32
    return %c0_i32, %c0_i32_0 : i32, i32
  }
  func.func @transform_2(%arg0: i32) -> (i32, i32) {
    %c0_i32 = arith.constant 0 : i32
    %c0_i32_0 = arith.constant 0 : i32
    return %arg0, %c0_i32 : i32, i32
  }
}

</mosaic_0001>

<bundles_post_ra>
// kernel: tpu_custom_call.1
= control target key start
LH: loop header
LB: loop body
LE: loop exit
PB: predicated region body
PF: predicated region fallthrough
CT: control target
= control target key end

     0   :  { %7 = vsyncpa [#allocation3], 0  ;;  %s924_s0 = inlined_call_operand.vmem [shape: f32[256,16], index: 0, kind: input, shape index: {}]   ;;  %s925_s1 = inlined_call_operand.vmem [shape: f32[16,128], index: 1, kind: input, shape index: {}]   ;;  %s926_s2 = inlined_call_operand.hbm [shape: bf16[256,128], index: 2, kind: output, shape index: {}]  }
   0x1   :  { %9 = vsyncpa [#allocation3 + $0x1], 0  ;;  %s796_s9 = smov 0   ;;  %s798_s10 = smov 0  }
   0x2   :  { %s800_s11 = smov 0   ;;  %s802_s12 = smov 0  }
   0x3 LB: > { %s817_s13 = sadd.s32 4294967295, %s776_s12   ;;  %s513_s14 = sadd.s32 4294967294, %s776_s12   ;;  %s776_s12 = sphi %s802_s12, %s932_s12   ;;  %s772_s11 = sphi %s800_s11, %s931_s11   ;;  %s768_s10 = sphi %s798_s10, %s930_s10   ;;  %s764_s9 = sphi %s796_s9, %s929_s9  }
   0x4   : > { %s821_s15 = sadd.s32 1, %s776_s12   ;;  %s69_s16 = sadd.s32 1, %s772_s11 }
   0x5   : > { %s66_s17 = ssub.s32 %s776_s12, %s821_s15  ;;  %p79_p0 = scmp.ne.s32.totalorder %s772_s11, %s768_s10 }
   0x6   : > { %p67_p1 = scmp.eq.s32.totalorder %s66_s17, 0  ;;  %p80_p2 = scmp.eq.s32.totalorder %s817_s13, 1 }
   0x7   : > { %p85_p3 = scmp.ne.s32.totalorder %s768_s10, %s764_s9  ;;  %p86_p4 = scmp.eq.s32.totalorder %s513_s14, 1 }
   0x8   : > { %s832_s18 = scalar_select %p67_p1, %s772_s11, %s69_s16  }
   0x9   : > { %p834_p5 = por %p80_p2, %p79_p0  ;;  %p838_p6 = por %p86_p4, %p85_p3 }
   0xa   : > { %p516_p7 = scmp.ge.s32.totalorder %s776_s12, 1  ;;  %p116_p8 = scmp.lt.s32.totalorder %s776_s12, 3 }
   0xc   : > { %p117_p9 = pnand %p516_p7, %p116_p8 }
   0xd   : > { %v161_v0 = vld [vmem:[%s925_s1] sm:$0xff] (!%p117_p9)  ;;  %v162_v1 = vld [vmem:[%s925_s1 + $0x8] sm:$0xff] (!%p117_p9)  ;;  %s518_s25 = sshll.u32 (!%p117_p9), %s817_s13, 4  ;;  %vm163_vm0 = vcmask (!%p117_p9), 130048   ;;  %s135_s30 = sand.u32 (!%p117_p9), 1, %s768_s10  }
   0xe   : > { %120 = sbr.rel (%p117_p9) target bundleno = 269 (0x10d), region = 28  ;;  %v667_v2 = vpack.c.bf16 (!%p117_p9), %v162_v1, %v161_v0  ;;  %p139_p10 = scmp.lt.s32.totalorder (!%p117_p9), %s518_s25, 31 }
   0xf   : > { %s517_s3 = sshll.u32 (!%p117_p9), %s135_s30, 6  ;;  %s573_s5 = sshll.u32 (!%p117_p9), %s817_s13, 10 }
  0x10   : > { %668 = vmatprep.subr.bf16.mxu0 (!%p117_p9), %v667_v2  ;;  %671 = vmatprep.subr.bf16.mxu1 (!%p117_p9), %v667_v2  ;;  %s137_s4 = scalar_lea.vmem (!%p117_p9), [#allocation2], %s517_s3  ;;  %s877_s14 = scalar_lea.hbm (!%p117_p9), %s926_s2, %s573_s5 }
  0x11   : > { %670 = vmatpush3.bf16.msra.mxu0 (!%p117_p9), %v667_v2  ;;  %672 = vmatpush3.bf16.msra.mxu1 (!%p117_p9), %v667_v2  ;;  %s451_s6 = sshll.u32 (!%p117_p9), %s137_s4, 4  ;;  %s883_s13 = scalar_lea.sflag (!%p117_p9), [#allocation3], %s135_s30  ;;  %s879_s6 = int_to_ptr.vmem [resolvable:$true] %s451_s6 }
  0x12   : > { %s714_s16 = scalar_lea.vmem (!%p117_p9), %s879_s6, 1024  ;;  %s778_s17 = smov (!%p117_p9), [#allocation2]  }
  0x13   : > { %p715_p11 = scmp.ne.s32.totalorder (!%p117_p9), %s879_s6, %s714_s16  ;;  %s718_s21 = sshll.u32 (!%p117_p9), %s778_s17, 4  ;;  %s719_s21 = int_to_ptr.vmem [resolvable:$false] %s718_s21 }
  0x14   : > { %s720_s22 = scalar_lea.vmem (!%p117_p9), %s719_s21, 2048  ;;  %p721_p0 = scmp.lt.s32.totalorder (!%p117_p9), %s879_s6, %s719_s21 }
  0x15   : > { %s934_s25 = smov (!%p139_p10, %s518_s25), 31  ;;  %p716_p12 = pnand %p715_p11, %p834_p5 }
  0x16   : > { %s519_s26 = sshll.u32 %s934_s25, 3  ;;  %p722_p1 = scmp.lt.s32.totalorder %s720_s22, %s714_s16 }
  0x17   : > { %s142_s29 = scalar_lea.vmem %s924_s0, %s519_s26  ;;  %p717_p13 = pneg %p716_p12 }
  0x18   : > { %v145_v3 = vld [vmem:[%s142_s29] sm:$0xff]  ;;  %v146_v5 = vld [vmem:[%s142_s29 + $0x8] sm:$0xff]  ;;  %v147_v7 = vld [vmem:[%s142_s29 + $0x10] sm:$0xff]  ;;  %p723_p2 = por %p722_p1, %p721_p0 }
  0x19   : > { %v153_v4 = vld [vmem:[%s142_s29 + $0x40] sm:$0xff]  ;;  %643 = vmatprep.mubr.msk.f32.mxu0 %vm163_vm0, %v145_v3  ;;  %v154_v6 = vld [vmem:[%s142_s29 + $0x48] sm:$0xff]  ;;  %v155_v8 = vld [vmem:[%s142_s29 + $0x50] sm:$0xff] }
  0x1a   : > { %655 = vmatprep.mubr.msk.f32.mxu1 %vm163_vm0, %v153_v4  ;;  %644 = vmatmul.mubr.msk.f32.vlgmr.msra.gmra.mrb[0].mxu0 %vm163_vm0, %v146_v5  ;;  %v148_v9 = vld [vmem:[%s142_s29 + $0x18] sm:$0xff]  ;;  %v149_v11 = vld [vmem:[%s142_s29 + $0x20] sm:$0xff]  ;;  %v150_v13 = vld [vmem:[%s142_s29 + $0x28] sm:$0xff]  ;;  %p724_p3 = pnand %p723_p2, %p717_p13 }
  0x1b   : > { %656 = vmatmul.mubr.msk.f32.vlgmr.msra.gmra.mrb[0].mxu1 %vm163_vm0, %v154_v6  ;;  %646 = vmatprep.mubr.msk.f32.mxu0 %vm163_vm0, %v147_v7  ;;  %v156_v10 = vld [vmem:[%s142_s29 + $0x58] sm:$0xff]  ;;  %v157_v12 = vld [vmem:[%s142_s29 + $0x60] sm:$0xff]  ;;  %v158_v14 = vld [vmem:[%s142_s29 + $0x68] sm:$0xff] }
  0x1c   : > { %658 = vmatprep.mubr.msk.f32.mxu1 %vm163_vm0, %v155_v8  ;;  %v151_v15 = vld [vmem:[%s142_s29 + $0x30] sm:$0xff]  ;;  %v152_v17 = vld [vmem:[%s142_s29 + $0x38] sm:$0xff] }
  0x1d   : > { %v159_v16 = vld [vmem:[%s142_s29 + $0x70] sm:$0xff]  ;;  %v160_v18 = vld [vmem:[%s142_s29 + $0x78] sm:$0xff] }
  0x1e   : > { %647 = vmatmul.mubr.msk.f32.gmra.mrb[2].mxu0 %vm163_vm0, %v148_v9 }
  0x1f   : > { %659 = vmatmul.mubr.msk.f32.gmra.mrb[2].mxu1 %vm163_vm0, %v156_v10  ;;  %649 = vmatprep.mubr.msk.f32.mxu0 %vm163_vm0, %v149_v11 }
  0x20   : > { %661 = vmatprep.mubr.msk.f32.mxu1 %vm163_vm0, %v157_v12 }
  0x22   : > { %650 = vmatmul.mubr.msk.f32.gmra.mrb[4].mxu0 %vm163_vm0, %v150_v13 }
  0x23   : > { %662 = vmatmul.mubr.msk.f32.gmra.mrb[4].mxu1 %vm163_vm0, %v158_v14  ;;  %652 = vmatprep.mubr.msk.f32.mxu0 %vm163_vm0, %v151_v15 }
  0x24   : > { %664 = vmatprep.mubr.msk.f32.mxu1 %vm163_vm0, %v159_v16 }
  0x26   : > { %653 = vmatmul.mubr.msk.f32.gmra.mrb[6].mxu0 %vm163_vm0, %v152_v17 }
  0x27   : > { %665 = vmatmul.mubr.msk.f32.gmra.mrb[6].mxu1 %vm163_vm0, %v160_v18 }
  0xed   : > { %v645_v19 = vpop.f32.mrb[0].mxu0 }
  0xee   : > { %v657_v20 = vpop.f32.mrb[0].mxu1  ;;  %v278_v21 = vpop.f32.mrb[1].mxu0 }
  0xef   : > { %v318_v22 = vpop.f32.mrb[1].mxu1  ;;  %v577_v23 = vpack.c.bf16 %v645_v19, %v278_v21 }
  0xf0   : > { %v597_v24 = vpack.c.bf16 %v657_v20, %v318_v22 }
  0xf1   : > { %578 = vst [vmem:[%s137_s4] sm:$0xff] %v577_v23   ;;  %v648_v25 = vpop.f32.mrb[2].mxu0 }
  0xf2   : > { %617 = vst [vmem:[%s137_s4 + $0x20] sm:$0xff] %v597_v24   ;;  %v660_v26 = vpop.f32.mrb[2].mxu1  ;;  %v288_v27 = vpop.f32.mrb[3].mxu0 }
  0xf3   : > { %v328_v28 = vpop.f32.mrb[3].mxu1  ;;  %v582_v29 = vpack.c.bf16 %v648_v25, %v288_v27 }
  0xf4   : > { %v602_v30 = vpack.c.bf16 %v660_v26, %v328_v28 }
  0xf5   : > { %614 = vst [vmem:[%s137_s4 + $0x8] sm:$0xff] %v582_v29   ;;  %v651_v31 = vpop.f32.mrb[4].mxu0 }
  0xf6   : > { %618 = vst [vmem:[%s137_s4 + $0x28] sm:$0xff] %v602_v30   ;;  %v663_v32 = vpop.f32.mrb[4].mxu1  ;;  %v298_v33 = vpop.f32.mrb[5].mxu0 }
  0xf7   : > { %v338_v34 = vpop.f32.mrb[5].mxu1  ;;  %v587_v35 = vpack.c.bf16 %v651_v31, %v298_v33 }
  0xf8   : > { %v607_v36 = vpack.c.bf16 %v663_v32, %v338_v34 }
  0xf9   : > { %615 = vst [vmem:[%s137_s4 + $0x10] sm:$0xff] %v587_v35   ;;  %v654_v37 = vpop.f32.mrb[6].mxu0 }
  0xfa   : > { %619 = vst [vmem:[%s137_s4 + $0x30] sm:$0xff] %v607_v36   ;;  %v666_v38 = vpop.f32.mrb[6].mxu1  ;;  %v308_v39 = vpop.f32.mrb[7].mxu0 }
  0xfb   : > { %v348_v40 = vpop.f32.mrb[7].mxu1  ;;  %v592_v41 = vpack.c.bf16 %v654_v37, %v308_v39 }
  0xfc   : > { %v612_v42 = vpack.c.bf16 %v666_v38, %v348_v40 }
  0xfd   : > { %616 = vst [vmem:[%s137_s4 + $0x18] sm:$0xff] %v592_v41  }
  0xfe   : > { %620 = vst [vmem:[%s137_s4 + $0x38] sm:$0xff] %v612_v42  }
  0xff   : > { %727 = shalt.err (!%p724_p3)
}
 0x100   : > { %s728_s23 = scalar_lea.hbm %s877_s14, 1024  ;;  %s732_s26 = scalar_lea.hbm %s926_s2, 2048 }
 0x101   : > { %p729_p4 = scmp.ne.s32.totalorder %s877_s14, %s728_s23  ;;  %p733_p9 = scmp.lt.u32.totalorder %s877_s14, %s926_s2 }
 0x102   : > { %p734_p10 = scmp.lt.u32.totalorder %s732_s26, %s728_s23  ;;  %p736_p12 = scmp.lt.u32.totalorder %s728_s23, %s877_s14 }
 0x103   : > { %p730_p7 = pnand %p729_p4, %p834_p5 }
 0x104   : > { %p735_p11 = por %p734_p10, %p733_p9 }
 0x105   : > { %p731_p8 = pneg %p730_p7 }
 0x106   : > { %p737_p13 = por %p736_p12, %p735_p11 }
 0x108   : > { %p738_p0 = pnand %p737_p13, %p731_p8 }
 0x10a   : > { %741 = shalt.err (!%p738_p0)
}
 0x10b   : > { %s779_s29 = smov 64   ;;  %s780_s30 = smov 4  }
 0x10c   : > { %673 = dma.vmem_to_hbm [thread:$0]  (%p834_p5), %s879_s6, 1024, %s877_s14, %s883_s13, %s779_s29, %s779_s29, %s780_s30  }
 0x10d PF: > { %p679_p1 = scmp.ge.s32.totalorder %s776_s12, 2  ;;  %s466_s3 = sand.u32 1, %s764_s9  }
 0x10e   : > { %s467_s4 = scalar_lea.sflag [#allocation3], %s466_s3 }
 0x10f   : > { %p676_p2 = pnand %p679_p1, %p838_p6 }
 0x111   : > { %759 = dma.done.wait (!%p676_p2), %s467_s4, 1024  }
 0x112   : > { %761 = vsyncadd (!%p676_p2), %s467_s4, 4294966272  ;;  %p12_p3 = scmp.ge.s32.totalorder %s821_s15, 4   ;;  %s929_s9 = smov %s768_s10 }
 0x113   : > { %s930_s10 = smov %s772_s11  ;;  %s931_s11 = smov %s832_s18 }
 0x114   : > { %s932_s12 = smov %s821_s15  ;;  %14 = sbr.rel (!%p12_p3) target bundleno = 3 (0x3), region = 63 }
 0x11b   :  { %472 = vsyncpa [#allocation3], 1 }
 0x11c   :  { %474 = vsyncpa [#allocation3 + $0x1], 1 }

</bundles_post_ra>
